<compile_context>
chip_gen: v6e
topology: v6e:2x2x1
jax: 0.10.0
libtpu: 0.0.40
codegen_flags: <defaults>
</compile_context>

<pallas_src>
import functools

import jax
import jax.numpy as jnp
from jax.experimental import pallas as pl
from jax.experimental.pallas import tpu as pltpu


# ----------------------------------------------------------------------------
# helpers
# ----------------------------------------------------------------------------
def _round_up(x, m):
    return (x + m - 1) // m * m


def _pick_tile(hw, max_tile=4096):
    # Largest divisor of hw that is <= max_tile and a multiple of 8
    # (or hw itself, which always satisfies the block constraint).
    for t in range(min(hw, max_tile), 0, -1):
        if hw % t == 0 and (t % 8 == 0 or t == hw):
            return t
    return hw


def im2col_3x3_same(x_nhwc):
    # Input is expected to already be bf16 so the 9x intermediate stays bf16.
    B, H, W, C = x_nhwc.shape
    xp = jnp.pad(x_nhwc, ((0, 0), (1, 1), (1, 1), (0, 0)))
    cols = [xp[:, dy:dy + H, dx:dx + W, :] for dy in range(3) for dx in range(3)]
    patches = jnp.concatenate(cols, axis=-1)               # (B, H, W, 9*C)
    return patches.reshape(B, H * W, 9 * C)                # (B, HW, 9*C)


# ----------------------------------------------------------------------------
# Fused kernel: conv stem (im2col matmul + bias + ReLU) + global avg pool
#               + all per-domain heads + domain-mean head, in one pass.
# grid = (B, HW // TILE_M); batch axis parallel (megacore), tile axis reduction
# ----------------------------------------------------------------------------
def _fused_kernel(p_ref, cw_ref, cb_ref, hw_ref, hb_ref, out_ref, acc_ref,
                  *, inv_hw, tile_m):
    t = pl.program_id(1)

    @pl.when(t == 0)
    def _():
        acc_ref[...] = jnp.zeros_like(acc_ref)

    # Conv stem: one MXU matmul per tile (bf16 inputs, f32 accumulation).
    y = jnp.dot(p_ref[0], cw_ref[...], preferred_element_type=jnp.float32)
    y = jnp.maximum(y + cb_ref[...], 0.0)                   # (tile_m, F_pad) f32

    # Sublane-preserving partial sums: pure VPU vreg adds, no XLU per step,
    # no masked per-step read-modify-write of the output block.
    if tile_m % 8 == 0:
        acc_ref[...] += y.reshape(tile_m // 8, 8, y.shape[-1]).sum(axis=0)
    else:  # fallback when HW has no divisor that is a multiple of 8
        acc_ref[0:1, :] += jnp.sum(y, axis=0, keepdims=True)

    # Finalize: collapse 8 -> 1, scale by 1/HW, fused lane-dense head matmul.
    @pl.when(t == pl.num_programs(1) - 1)
    def _():
        feats = jnp.sum(acc_ref[...], axis=0, keepdims=True) * inv_hw  # (1, F_pad)
        logits = jnp.dot(feats, hw_ref[...],
                         preferred_element_type=jnp.float32) + hb_ref[...]
        out_ref[...] = logits[None]                          # (1, 1, DC_pad)


def stem_pool_heads(patches_bf16, conv_w, conv_b, head_w_all, head_b_all):
    # patches: (B, HW, K) bf16; conv_w: (K, F_pad) bf16; conv_b: (1, F_pad) f32
    # head_w_all: (F_pad, DC_pad) f32; head_b_all: (1, DC_pad) f32
    B, HW, K = patches_bf16.shape
    F_pad = conv_w.shape[1]
    DC_pad = head_w_all.shape[1]
    tile_m = _pick_tile(HW)
    n_tiles = HW // tile_m

    kernel = functools.partial(_fused_kernel, inv_hw=1.0 / HW, tile_m=tile_m)

    # Explicit VMEM budget (v7x has only 64 MiB physical / 32 MiB scoped).
    vmem_bytes = (2 * tile_m * K * 2          # double-buffered patch blocks (bf16)
                  + K * F_pad * 2             # resident conv weights
                  + F_pad * 4                 # resident conv bias
                  + F_pad * DC_pad * 4        # resident head weights
                  + DC_pad * 4                # resident head bias
                  + 8 * F_pad * 4             # accumulator scratch
                  + 2 * DC_pad * 4            # output double-buffer
                  + tile_m * F_pad * 4)       # activation intermediate
    vmem_limit = int(min(max(2 * vmem_bytes, 16 << 20), 48 << 20))

    out = pl.pallas_call(
        kernel,
        out_shape=jax.ShapeDtypeStruct((B, 1, DC_pad), jnp.float32),
        grid_spec=pltpu.PrefetchScalarGridSpec(
            num_scalar_prefetch=0,
            grid=(B, n_tiles),
            in_specs=[
                pl.BlockSpec((1, tile_m, K), lambda b, t: (b, t, 0)),
                pl.BlockSpec((K, F_pad), lambda b, t: (0, 0)),     # resident
                pl.BlockSpec((1, F_pad), lambda b, t: (0, 0)),     # resident
                pl.BlockSpec((F_pad, DC_pad), lambda b, t: (0, 0)),# resident
                pl.BlockSpec((1, DC_pad), lambda b, t: (0, 0)),    # resident
            ],
            out_specs=pl.BlockSpec((1, 1, DC_pad), lambda b, t: (b, 0, 0)),
            scratch_shapes=[pltpu.VMEM((8, F_pad), jnp.float32)],
        ),
        compiler_params=pltpu.CompilerParams(
            dimension_semantics=("parallel", "arbitrary"),
            vmem_limit_bytes=vmem_limit),
        cost_estimate=pl.CostEstimate(
            flops=2 * B * HW * K * F_pad + 2 * B * F_pad * DC_pad,
            transcendentals=0,
            bytes_accessed=(B * HW * K * 2 + K * F_pad * 2 + F_pad * 4
                            + F_pad * DC_pad * 4 + DC_pad * 4
                            + B * DC_pad * 4)),
    )(patches_bf16, conv_w, conv_b, head_w_all, head_b_all)
    return out.reshape(B, DC_pad)


# ----------------------------------------------------------------------------
# Full forward
# ----------------------------------------------------------------------------
@functools.partial(jax.jit, static_argnames=("training",))
def domain_independent_classifier_forward(x_nchw, params, training=False):
    B, C_in, H, W = x_nchw.shape
    # bf16 BEFORE im2col: the (B, HW, 9*Cin) intermediate in HBM is bf16.
    x_nhwc = jnp.transpose(x_nchw, (0, 2, 3, 1)).astype(jnp.bfloat16)
    patches = im2col_3x3_same(x_nhwc)                           # (B, HW, 9*Cin)

    F = params["conv_w"].shape[1]
    F_pad = _round_up(F, 128)                                   # lane-dense N
    conv_w = params["conv_w"].astype(jnp.bfloat16)
    conv_b = params["conv_b"]
    if F_pad != F:
        conv_w = jnp.pad(conv_w, ((0, 0), (0, F_pad - F)))
        conv_b = jnp.pad(conv_b, ((0, 0), (0, F_pad - F)))

    D, _, C = params["head_w"].shape
    # All D heads + an appended mean head (mean is linear) -> one lane-dense
    # matmul whose output columns are [per-domain logits | mean logits | pad].
    w_flat = jnp.transpose(params["head_w"], (1, 0, 2)).reshape(F, D * C)
    w_mean = params["head_w"].mean(axis=0)                      # (F, C)
    w_all = jnp.concatenate([w_flat, w_mean], axis=1)           # (F, D*C + C)
    b_flat = params["head_b"].reshape(1, D * C)
    b_mean = params["head_b"].mean(axis=0).reshape(1, C)
    b_all = jnp.concatenate([b_flat, b_mean], axis=1)

    DC = D * C + C
    DC_pad = _round_up(DC, 128)
    if F_pad != F:
        w_all = jnp.pad(w_all, ((0, F_pad - F), (0, 0)))        # padded rows = 0
    if DC_pad != DC:
        w_all = jnp.pad(w_all, ((0, 0), (0, DC_pad - DC)))
        b_all = jnp.pad(b_all, ((0, 0), (0, DC_pad - DC)))

    out = stem_pool_heads(patches, conv_w, conv_b, w_all, b_all)  # (B, DC_pad)

    if training:
        return out[:, :D * C].reshape(B, D, C)                  # torch.stack(dim=1)
    return out[:, D * C:D * C + C]                              # mean over domains


# ----------------------------------------------------------------------------
# Params + pure-JAX reference (mirrors the kernel's bf16 matmul precision)
# ----------------------------------------------------------------------------
def init_params(key, c_in, feat_dim, num_classes, num_domain):
    k1, k2, k3, k4 = jax.random.split(key, 4)
    conv_w = jax.random.normal(k1, (9 * c_in, feat_dim), jnp.float32) * 0.05
    conv_b = jax.random.normal(k2, (1, feat_dim), jnp.float32) * 0.05
    head_w = jax.random.normal(k3, (num_domain, feat_dim, num_classes),
                               jnp.float32) * 0.05
    head_b = jax.random.normal(k4, (num_domain, num_classes), jnp.float32) * 0.05
    return {"conv_w": conv_w, "conv_b": conv_b,
            "head_w": head_w, "head_b": head_b}


def reference_forward(x_nchw, params, training=False):
    x_nhwc = jnp.transpose(x_nchw, (0, 2, 3, 1)).astype(jnp.bfloat16)
    patches = im2col_3x3_same(x_nhwc)                           # (B, HW, K) bf16
    w = params["conv_w"].astype(jnp.bfloat16)
    act = jax.lax.dot_general(patches, w, (((2,), (0,)), ((), ())),
                              preferred_element_type=jnp.float32)
    act = jnp.maximum(act + params["conv_b"][None], 0.0)        # (B, HW, F)
    feats = act.mean(axis=1)                                    # (B, F)
    logits = jnp.einsum("bf,dfc->bdc", feats, params["head_w"],
                        preferred_element_type=jnp.float32) + params["head_b"][None]
    if training:
        return logits                                           # (B, D, C)
    return logits.mean(axis=1)                                  # (B, C)


if __name__ == "__main__":
    B, C_in, H, W = 2, 4, 16, 16
    FEAT_DIM, NUM_CLASSES, NUM_DOMAIN = 32, 10, 3

    key = jax.random.PRNGKey(0)
    kx, kp = jax.random.split(key)
    x = jax.random.normal(kx, (B, C_in, H, W), jnp.float32)
    params = init_params(kp, C_in, FEAT_DIM, NUM_CLASSES, NUM_DOMAIN)

    out_eval = jax.block_until_ready(
        domain_independent_classifier_forward(x, params, training=False))
    out_train = jax.block_until_ready(
        domain_independent_classifier_forward(x, params, training=True))

    ref_eval = reference_forward(x, params, training=False)
    ref_train = reference_forward(x, params, training=True)

    assert out_eval.shape == (B, NUM_CLASSES)
    assert out_train.shape == (B, NUM_DOMAIN, NUM_CLASSES)
    assert jnp.allclose(out_eval, ref_eval, atol=1e-3, rtol=1e-3)
    assert jnp.allclose(out_train, ref_train, atol=1e-3, rtol=1e-3)

    print("KERNEL_OK")
</pallas_src>

<mosaic_0001>
module attributes {stable_mosaic.version = 11 : i64} {
  func.func @_fused_kernel(%arg0: i32, %arg1: i32, %arg2: memref<1x256x36xbf16, #tpu.memory_space<vmem>>, %arg3: memref<36x128xbf16, #tpu.memory_space<vmem>>, %arg4: memref<1x128xf32, #tpu.memory_space<vmem>>, %arg5: memref<128x128xf32, #tpu.memory_space<vmem>>, %arg6: memref<1x128xf32, #tpu.memory_space<vmem>>, %arg7: memref<1x1x128xf32, #tpu.memory_space<vmem>>, %arg8: memref<8x128xf32, #tpu.memory_space<vmem>>) attributes {dimension_semantics = [#tpu.dimension_semantics<parallel>, #tpu.dimension_semantics<arbitrary>], iteration_bounds = array<i64: 2, 1>, scalar_prefetch = 0 : i64, scratch_operands = 1 : i64, tpu.core_type = #tpu.core_type<tc>, window_params = [{transform_indices = @transform_0, window_bounds = array<i64: 1, 256, 36>}, {pipeline_mode = #tpu.pipeline_mode<synchronous>, transform_indices = @transform_1, window_bounds = array<i64: 36, 128>}, {pipeline_mode = #tpu.pipeline_mode<synchronous>, transform_indices = @transform_2, window_bounds = array<i64: 1, 128>}, {pipeline_mode = #tpu.pipeline_mode<synchronous>, transform_indices = @transform_3, window_bounds = array<i64: 128, 128>}, {pipeline_mode = #tpu.pipeline_mode<synchronous>, transform_indices = @transform_4, window_bounds = array<i64: 1, 128>}, {transform_indices = @transform_5, window_bounds = array<i64: 1, 1, 128>}]} {
    %c0_i32 = arith.constant 0 : i32
    %0 = arith.cmpi eq, %arg1, %c0_i32 : i32
    %1 = arith.extui %0 : i1 to i32
    %c0_i32_0 = arith.constant 0 : i32
    %2 = arith.cmpi ne, %1, %c0_i32_0 : i32
    scf.if %2 {
      %cst_15 = arith.constant 0.000000e+00 : f32
      %20 = vector.broadcast %cst_15 : f32 to vector<8x128xf32>
      %c0_16 = arith.constant 0 : index
      %c0_17 = arith.constant 0 : index
      %21 = vector.load %arg8[%c0_16, %c0_17] : memref<8x128xf32, #tpu.memory_space<vmem>>, vector<8x128xf32>
      tpu.vector_store %arg8[%c0_16, %c0_17], %20 {strides = array<i32>} : memref<8x128xf32, #tpu.memory_space<vmem>>, vector<8x128xf32>,
    } else {
    }
    %c0 = arith.constant 0 : index
    %c0_1 = arith.constant 0 : index
    %c0_2 = arith.constant 0 : index
    %3 = vector.load %arg2[%c0, %c0_1, %c0_2] : memref<1x256x36xbf16, #tpu.memory_space<vmem>>, vector<1x256x36xbf16>
    %4 = vector.shape_cast %3 : vector<1x256x36xbf16> to vector<256x36xbf16>
    %c0_3 = arith.constant 0 : index
    %c0_4 = arith.constant 0 : index
    %5 = vector.load %arg3[%c0_3, %c0_4] : memref<36x128xbf16, #tpu.memory_space<vmem>>, vector<36x128xbf16>
    %cst = arith.constant dense<0.000000e+00> : vector<256x128xf32>
    %6 = tpu.matmul %4, %5, %cst {dimension_numbers = #tpu.dot_dimension_numbers<[1], [0], [0], [1], [0, 0, 1, 1], [], []>} : vector<256x36xbf16>, vector<36x128xbf16>, vector<256x128xf32> -> vector<256x128xf32>
    %c0_5 = arith.constant 0 : index
    %c0_6 = arith.constant 0 : index
    %7 = vector.load %arg4[%c0_5, %c0_6] : memref<1x128xf32, #tpu.memory_space<vmem>>, vector<1x128xf32>
    %8 = vector.broadcast %7 : vector<1x128xf32> to vector<256x128xf32>
    %9 = arith.addf %6, %8 : vector<256x128xf32>
    %cst_7 = arith.constant 0.000000e+00 : f32
    %10 = vector.broadcast %cst_7 : f32 to vector<256x128xf32>
    %11 = arith.maximumf %9, %10 : vector<256x128xf32>
    %c0_8 = arith.constant 0 : index
    %c0_9 = arith.constant 0 : index
    %12 = vector.load %arg8[%c0_8, %c0_9] : memref<8x128xf32, #tpu.memory_space<vmem>>, vector<8x128xf32>
    %13 = vector.shape_cast %11 : vector<256x128xf32> to vector<32x8x128xf32>
    %cst_10 = arith.constant dense<0.000000e+00> : vector<8x128xf32>
    %14 = vector.multi_reduction <add>, %13, %cst_10 [0] : vector<32x8x128xf32> to vector<8x128xf32>
    %15 = arith.addf %12, %14 : vector<8x128xf32>
    %c0_11 = arith.constant 0 : index
    %c0_12 = arith.constant 0 : index
    %16 = vector.load %arg8[%c0_11, %c0_12] : memref<8x128xf32, #tpu.memory_space<vmem>>, vector<8x128xf32>
    tpu.vector_store %arg8[%c0_11, %c0_12], %15 {strides = array<i32>} : memref<8x128xf32, #tpu.memory_space<vmem>>, vector<8x128xf32>,
    %c0_i32_13 = arith.constant 0 : i32
    %17 = arith.cmpi eq, %arg1, %c0_i32_13 : i32
    %18 = arith.extui %17 : i1 to i32
    %c0_i32_14 = arith.constant 0 : i32
    %19 = arith.cmpi ne, %18, %c0_i32_14 : i32
    scf.if %19 {
      %c0_15 = arith.constant 0 : index
      %c0_16 = arith.constant 0 : index
      %20 = vector.load %arg8[%c0_15, %c0_16] : memref<8x128xf32, #tpu.memory_space<vmem>>, vector<8x128xf32>
      %cst_17 = arith.constant dense<0.000000e+00> : vector<128xf32>
      %21 = vector.multi_reduction <add>, %20, %cst_17 [0] : vector<8x128xf32> to vector<128xf32>
      %22 = vector.shape_cast %21 : vector<128xf32> to vector<1x128xf32>
      %cst_18 = arith.constant 3.906250e-03 : f32
      %23 = vector.broadcast %cst_18 : f32 to vector<1x128xf32>
      %24 = arith.mulf %22, %23 : vector<1x128xf32>
      %c0_19 = arith.constant 0 : index
      %c0_20 = arith.constant 0 : index
      %25 = vector.load %arg5[%c0_19, %c0_20] : memref<128x128xf32, #tpu.memory_space<vmem>>, vector<128x128xf32>
      %cst_21 = arith.constant dense<0.000000e+00> : vector<1x128xf32>
      %26 = tpu.matmul %24, %25, %cst_21 {dimension_numbers = #tpu.dot_dimension_numbers<[1], [0], [0], [1], [0, 0, 1, 1], [], []>} : vector<1x128xf32>, vector<128x128xf32>, vector<1x128xf32> -> vector<1x128xf32>
      %c0_22 = arith.constant 0 : index
      %c0_23 = arith.constant 0 : index
      %27 = vector.load %arg6[%c0_22, %c0_23] : memref<1x128xf32, #tpu.memory_space<vmem>>, vector<1x128xf32>
      %28 = arith.addf %26, %27 : vector<1x128xf32>
      %29 = vector.shape_cast %28 : vector<1x128xf32> to vector<1x1x128xf32>
      %c0_24 = arith.constant 0 : index
      %c0_25 = arith.constant 0 : index
      %c0_26 = arith.constant 0 : index
      %30 = vector.load %arg7[%c0_24, %c0_25, %c0_26] : memref<1x1x128xf32, #tpu.memory_space<vmem>>, vector<1x1x128xf32>
      tpu.vector_store %arg7[%c0_24, %c0_25, %c0_26], %29 {strides = array<i32>} : memref<1x1x128xf32, #tpu.memory_space<vmem>>, vector<1x1x128xf32>,
    } else {
    }
    return
  }
  func.func @transform_0(%arg0: i32, %arg1: i32) -> (i32, i32, i32) {
    %c0_i32 = arith.constant 0 : i32
    %c0_i32_0 = arith.constant 0 : i32
    return %arg0, %arg1, %c0_i32 : i32, i32, i32
  }
  func.func @transform_1(%arg0: i32, %arg1: i32) -> (i32, i32) {
    %c0_i32 = arith.constant 0 : i32
    %c0_i32_0 = arith.constant 0 : i32
    %c0_i32_1 = arith.constant 0 : i32
    return %c0_i32, %c0_i32_0 : i32, i32
  }
  func.func @transform_2(%arg0: i32, %arg1: i32) -> (i32, i32) {
    %c0_i32 = arith.constant 0 : i32
    %c0_i32_0 = arith.constant 0 : i32
    %c0_i32_1 = arith.constant 0 : i32
    return %c0_i32, %c0_i32_0 : i32, i32
  }
  func.func @transform_3(%arg0: i32, %arg1: i32) -> (i32, i32) {
    %c0_i32 = arith.constant 0 : i32
    %c0_i32_0 = arith.constant 0 : i32
    %c0_i32_1 = arith.constant 0 : i32
    return %c0_i32, %c0_i32_0 : i32, i32
  }
  func.func @transform_4(%arg0: i32, %arg1: i32) -> (i32, i32) {
    %c0_i32 = arith.constant 0 : i32
    %c0_i32_0 = arith.constant 0 : i32
    %c0_i32_1 = arith.constant 0 : i32
    return %c0_i32, %c0_i32_0 : i32, i32
  }
  func.func @transform_5(%arg0: i32, %arg1: i32) -> (i32, i32, i32) {
    %c0_i32 = arith.constant 0 : i32
    %c0_i32_0 = arith.constant 0 : i32
    %c0_i32_1 = arith.constant 0 : i32
    return %arg0, %c0_i32, %c0_i32_0 : i32, i32, i32
  }
}

</mosaic_0001>

<bundles_post_ra>
// kernel: domain_independent_classifier_forward.1
= control target key start
LH: loop header
LB: loop body
LE: loop exit
PB: predicated region body
PF: predicated region fallthrough
CT: control target
= control target key end

     0   :  { %s1098_s18 = smov 0   ;;  %s1100_s19 = smov 0   ;;  %s1278_s0 = inlined_call_operand.vmem [shape: bf16[2,256,36], index: 0, kind: input, shape index: {}]   ;;  %s1279_s1 = inlined_call_operand.vmem [shape: bf16[36,128], index: 1, kind: input, shape index: {}]   ;;  %s1280_s2 = inlined_call_operand.vmem [shape: f32[1,128], index: 2, kind: input, shape index: {}]   ;;  %s1281_s3 = inlined_call_operand.vmem [shape: f32[128,128], index: 3, kind: input, shape index: {}]   ;;  %s1282_s4 = inlined_call_operand.vmem [shape: f32[1,128], index: 4, kind: input, shape index: {}]   ;;  %s1283_s5 = inlined_call_operand.vmem [shape: f32[2,1,128], index: 5, kind: output, shape index: {}]  }
   0x1   :  { %s1102_s20 = smov 0  }
   0x2 LB: > { %s27_s21 = sadd.s32 1, %s1060_s19  ;;  %p838_p0 = scmp.ge.s32.totalorder %s1064_s20, 1  ;;  %s1064_s20 = sphi %s1102_s20, %s15_s20   ;;  %s1060_s19 = sphi %s1100_s19, %s1285_s19   ;;  %s1056_s18 = sphi %s1098_s18, %s1284_s18  }
   0x3   : > { %p29_p1 = scmp.ge.s32.totalorder %s27_s21, 2  ;;  %p206_p2 = scmp.lt.s32.totalorder %s1064_s20, 3 }
   0x5   : > { %s1287_s21 = smov (%p29_p1, %s27_s21), 0  ;;  %p207_p3 = pnand %p838_p0, %p206_p2 }
   0x6   : > { %p237_p4 = scmp.lt.s32.totalorder (!%p207_p3), %s1056_s18, 1 }
   0x7   : > { %210 = sbr.rel (%p207_p3) target bundleno = 500 (0x1f4), region = 40 }
   0xc   : > { %v1023_v0 = vld [vmem:[%s1279_s1 + $0x10] ss:$0 sps:$4 sm:$0x33]   ;;  %vm443_vm0 = vcmask 1041408   ;;  %v1024_v1 = vld [vmem:[%s1279_s1 + $0x8] sm:$0xff]   ;;  %s1289_s18 = smov (!%p237_p4, %s1056_s18), 1 }
   0xd   : > { %995 = vmatprep.subr.msk.bf16.mxu0 %vm443_vm0, %v1023_v0  ;;  %v445_v2 = vsel %vm443_vm0, %v1023_v0, 0  ;;  %996 = vmatprep.subr.msk.bf16.mxu1 %vm443_vm0, %v1023_v0  ;;  %v1025_v3 = vld [vmem:[%s1279_s1] sm:$0xff]   ;;  %s879_s28 = sshll.u32 %s1289_s18, 7  ;;  %vm394_vm1 = vcmask 293888   ;;  %v1066_v20 = vmov 0.0   ;;  %v700_v21 = vld [vmem:[%s1281_s3 + $0x78] sm:$0xff] }
   0xe   : > { %917 = vmatpush3.bf16.msra.mxu0 %v445_v2  ;;  %992 = vmatpush3.bf16.msra.mxu1 %v445_v2  ;;  %s1131_s6 = scalar_lea.vmem %s1278_s0, %s879_s28  ;;  %v699_v22 = vld [vmem:[%s1281_s3 + $0x70] sm:$0xff]  ;;  %v698_v23 = vld [vmem:[%s1281_s3 + $0x68] sm:$0xff]  ;;  %v697_v24 = vld [vmem:[%s1281_s3 + $0x60] sm:$0xff]  ;;  %vm1067_vm2 = vmmov 0   ;;  %s248_s28 = scalar_lea.vmem %s1283_s5, %s1289_s18 }
   0xf   : > { %918 = vmatprep.subr.bf16.mxu0 %v1024_v1  ;;  %990 = vmatprep.subr.bf16.mxu1 %v1024_v1  ;;  %v1026_v4 = vld [vmem:[%s1131_s6] sm:$0xff]   ;;  %v1027_v5 = vld [vmem:[%s1131_s6 + $0x8] sm:$0xff]   ;;  %v1028_v6 = vld [vmem:[%s1131_s6 + $0x10] sm:$0xff]  }
  0x10   : > { %922 = vmatprep.mubr.msk.bf16.mxu0 %vm394_vm1, %v1026_v4  ;;  %v1034_v7 = vld [vmem:[%s1131_s6 + $0x40] sm:$0xff]   ;;  %v1035_v8 = vld [vmem:[%s1131_s6 + $0x48] sm:$0xff]   ;;  %v1036_v9 = vld [vmem:[%s1131_s6 + $0x50] sm:$0xff]  }
  0x11   : > { %938 = vmatprep.mubr.msk.bf16.mxu1 %vm394_vm1, %v1034_v7  ;;  %v1029_v10 = vld [vmem:[%s1131_s6 + $0x18] sm:$0xff]   ;;  %v1030_v11 = vld [vmem:[%s1131_s6 + $0x20] sm:$0xff]   ;;  %v1031_v14 = vld [vmem:[%s1131_s6 + $0x28] sm:$0xff]  }
  0x12   : > { %919 = vmatpush3.bf16.msra.mxu0 %v1024_v1  ;;  %993 = vmatpush3.bf16.msra.mxu1 %v1024_v1  ;;  %v1037_v12 = vld [vmem:[%s1131_s6 + $0x58] sm:$0xff]   ;;  %v1038_v13 = vld [vmem:[%s1131_s6 + $0x60] sm:$0xff]   ;;  %v1032_v15 = vld [vmem:[%s1131_s6 + $0x30] sm:$0xff]  }
  0x13   : > { %920 = vmatprep.subr.bf16.mxu0 %v1025_v3  ;;  %991 = vmatprep.subr.bf16.mxu1 %v1025_v3  ;;  %v1039_v16 = vld [vmem:[%s1131_s6 + $0x68] sm:$0xff]   ;;  %v1040_v17 = vld [vmem:[%s1131_s6 + $0x70] sm:$0xff]   ;;  %v1033_v18 = vld [vmem:[%s1131_s6 + $0x38] sm:$0xff]  }
  0x14   : > { %v1041_v19 = vld [vmem:[%s1131_s6 + $0x78] sm:$0xff]   ;;  %v695_v26 = vld [vmem:[%s1281_s3 + $0x50] sm:$0xff]  ;;  %v694_v27 = vld [vmem:[%s1281_s3 + $0x48] sm:$0xff] }
  0x15   : > { %v696_v25 = vld [vmem:[%s1281_s3 + $0x58] sm:$0xff]  ;;  %v693_v28 = vld [vmem:[%s1281_s3 + $0x40] sm:$0xff]  ;;  %v691_v30 = vld [vmem:[%s1281_s3 + $0x30] sm:$0xff] }
  0x16   : > { %921 = vmatpush3.bf16.msra.mxu0 %v1025_v3  ;;  %994 = vmatpush3.bf16.msra.mxu1 %v1025_v3  ;;  %v692_v29 = vld [vmem:[%s1281_s3 + $0x38] sm:$0xff]  ;;  %v690_v31 = vld [vmem:[%s1281_s3 + $0x28] sm:$0xff]  ;;  %v689_v32 = vld [vmem:[%s1281_s3 + $0x20] sm:$0xff] }
  0x17   : > { %954 = vmatprep.subr.mxu1 %v1066_v20  ;;  %v688_v33 = vld [vmem:[%s1281_s3 + $0x18] sm:$0xff]  ;;  %v687_v34 = vld [vmem:[%s1281_s3 + $0x10] sm:$0xff]  ;;  %v686_v35 = vld [vmem:[%s1281_s3 + $0x8] sm:$0xff] }
  0x18   : > { %v685_v36 = vld [vmem:[%s1281_s3] sm:$0xff] }
  0x19   : > { %923 = vmatmul.mubr.msk.bf16.vlgmr.msra.gmra.mxu0 %vm394_vm1, %v1027_v5  ;;  %939 = vmatmul.mubr.msk.bf16.vlgmr.msra.gmra.mxu1 %vm394_vm1, %v1035_v8  ;;  %v1216_v39 = vld [vmem:[%s1280_s2] ss:$0 sm:$0xff] }
  0x1a   : > { %926 = vmatprep.mubr.msk.bf16.mxu0 %vm394_vm1, %v1028_v6  ;;  %942 = vmatprep.mubr.msk.bf16.mxu1 %vm394_vm1, %v1036_v9 }
  0x1b   : > { %955 = vmatpush3.msra.mxu1 %v700_v21 }
  0x1c   : > { %956 = vmatprep.subr.mxu1 %v1066_v20 }
  0x1d   : > { %957 = vmatpush3.msra.mxu1 %v699_v22 }
  0x1e   : > { %958 = vmatprep.subr.mxu1 %v1066_v20 }
  0x1f   : > { %959 = vmatpush3.msra.mxu1 %v698_v23 }
  0x20   : > { %960 = vmatprep.subr.mxu1 %v1066_v20 }
  0x21   : > { %927 = vmatmul.mubr.msk.bf16.gmra.mxu0 %vm394_vm1, %v1029_v10  ;;  %943 = vmatmul.mubr.msk.bf16.gmra.mxu1 %vm394_vm1, %v1037_v12 }
  0x22   : > { %930 = vmatprep.mubr.msk.bf16.mxu0 %vm394_vm1, %v1030_v11  ;;  %946 = vmatprep.mubr.msk.bf16.mxu1 %vm394_vm1, %v1038_v13 }
  0x23   : > { %961 = vmatpush3.msra.mxu1 %v697_v24 }
  0x24   : > { %962 = vmatprep.subr.mxu1 %v1066_v20 }
  0x25   : > { %963 = vmatpush3.msra.mxu1 %v696_v25 }
  0x26   : > { %964 = vmatprep.subr.mxu1 %v1066_v20 }
  0x27   : > { %965 = vmatpush3.msra.mxu1 %v695_v26 }
  0x28   : > { %966 = vmatprep.subr.mxu1 %v1066_v20 }
  0x29   : > { %931 = vmatmul.mubr.msk.bf16.gmra.mxu0 %vm394_vm1, %v1031_v14  ;;  %947 = vmatmul.mubr.msk.bf16.gmra.mxu1 %vm394_vm1, %v1039_v16 }
  0x2a   : > { %934 = vmatprep.mubr.msk.bf16.mxu0 %vm394_vm1, %v1032_v15  ;;  %950 = vmatprep.mubr.msk.bf16.mxu1 %vm394_vm1, %v1040_v17 }
  0x2b   : > { %967 = vmatpush3.msra.mxu1 %v694_v27 }
  0x2c   : > { %968 = vmatprep.subr.mxu1 %v1066_v20 }
  0x2d   : > { %969 = vmatpush3.msra.mxu1 %v693_v28 }
  0x2e   : > { %970 = vmatprep.subr.mxu1 %v1066_v20 }
  0x2f   : > { %971 = vmatpush3.msra.mxu1 %v692_v29 }
  0x30   : > { %972 = vmatprep.subr.mxu1 %v1066_v20 }
  0x31   : > { %935 = vmatmul.mubr.msk.bf16.gmra.mxu0 %vm394_vm1, %v1033_v18  ;;  %951 = vmatmul.mubr.msk.bf16.gmra.mxu1 %vm394_vm1, %v1041_v19 }
  0x32   : > { %973 = vmatpush3.msra.mxu1 %v691_v30  ;;  %986 = vmatprep.mubr.msk.f32.mxu1 %vm1067_vm2, %v1066_v20 }
  0x33   : > { %974 = vmatprep.subr.mxu1 %v1066_v20 }
  0x34   : > { %975 = vmatpush3.msra.mxu1 %v690_v31 }
  0x35   : > { %976 = vmatprep.subr.mxu1 %v1066_v20 }
  0x36   : > { %977 = vmatpush3.msra.mxu1 %v689_v32 }
  0x37   : > { %978 = vmatprep.subr.mxu1 %v1066_v20 }
  0x38   : > { %979 = vmatpush3.msra.mxu1 %v688_v33 }
  0x39   : > { %980 = vmatprep.subr.mxu1 %v1066_v20 }
  0x3a   : > { %981 = vmatpush3.msra.mxu1 %v687_v34 }
  0x3b   : > { %982 = vmatprep.subr.mxu1 %v1066_v20 }
  0x3c   : > { %983 = vmatpush3.msra.mxu1 %v686_v35 }
  0x3d   : > { %984 = vmatprep.subr.mxu1 %v1066_v20 }
  0x3e   : > { %985 = vmatpush3.msra.mxu1 %v685_v36 }
  0xd9   : > { %v924_v37 = vpop.f32.mrf.mxu0  ;;  %v1218_v41 = vpop.f32.mrf.mxu1 }
  0xda   : > { %v490_v45 = vadd.f32 %v924_v37, %v1216_v39 }
  0xdb   : > { %v481_v38 = vpop.f32.mrf.mxu0  ;;  %v1221_v44 = vpop.f32.mrf.mxu1 }
  0xdc   : > { %v482_v42 = vadd.f32 %v1216_v39, %v481_v38  ;;  %v610_v54 = vmax.f32 %v490_v45, 0.0 }
  0xdd   : > { %v925_v40 = vpop.f32.mrf.mxu0  ;;  %v1225_v48 = vpop.f32.mrf.mxu1 }
  0xde   : > { %v608_v49 = vmax.f32 %v482_v42, 0.0  ;;  %v493_v50 = vadd.f32 %v925_v40, %v1216_v39 }
  0xdf   : > { %v484_v43 = vpop.f32.mrf.mxu0  ;;  %v548_v53 = vpop.f32.mrf.mxu1 }
  0xe0   : > { %v485_v46 = vadd.f32 %v1216_v39, %v484_v43  ;;  %v611_v58 = vmax.f32 %v493_v50, 0.0 }
  0xe1   : > { %v928_v47 = vpop.f32.mrf.mxu0  ;;  %v1229_v61 = vpop.f32.mrf.mxu1 }
  0xe2   : > { %v609_v51 = vmax.f32 %v485_v46, 0.0  ;;  %v506_v62 = vadd.f32 %v928_v47, %v1216_v39  ;;  %v546_v46 = vadd.f32 %v1216_v39, %v1221_v44 }
  0xe3   : > { %v497_v52 = vpop.f32.mrf.mxu0  ;;  %v561_v7 = vpop.f32.mrf.mxu1 }
  0xe4   : > { %v641_v55 = vadd.f32 %v609_v51, %v608_v49  ;;  %v498_v56 = vadd.f32 %v1216_v39, %v497_v52  ;;  %v614_v8 = vmax.f32 %v506_v62, 0.0  ;;  %v549_v51 = vadd.f32 %v1216_v39, %v548_v53 }
  0xe5   : > { %v929_v57 = vpop.f32.mrf.mxu0  ;;  %v945_v15 = vpop.f32.mrf.mxu1  ;;  %v562_v44 = vadd.f32 %v1216_v39, %v561_v7 }
  0xe6   : > { %v642_v59 = vadd.f32 %v641_v55, %v610_v54  ;;  %v612_v63 = vmax.f32 %v498_v56, 0.0  ;;  %v509_v4 = vadd.f32 %v929_v57, %v1216_v39  ;;  %v554_v54 = vadd.f32 %v1218_v41, %v1216_v39 }
  0xe7   : > { %v500_v60 = vpop.f32.mrf.mxu0  ;;  %v564_v25 = vpop.f32.mrf.mxu1  ;;  %v624_v55 = vmax.f32 %v546_v46, 0.0  ;;  %v557_v57 = vadd.f32 %v1225_v48, %v1216_v39  ;;  %v570_v41 = vadd.f32 %v1229_v61, %v1216_v39  ;;  %v573_v48 = vadd.f32 %v945_v15, %v1216_v39 }
  0xe8   : > { %v643_v0 = vadd.f32 %v642_v59, %v611_v58  ;;  %v501_v1 = vadd.f32 %v1216_v39, %v500_v60  ;;  %v615_v12 = vmax.f32 %v509_v4, 0.0  ;;  %v625_v58 = vmax.f32 %v549_v51, 0.0 }
  0xe9   : > { %v932_v2 = vpop.f32.mrf.mxu0  ;;  %v948_v33 = vpop.f32.mrf.mxu1  ;;  %v626_v62 = vmax.f32 %v554_v54, 0.0  ;;  %v565_v53 = vadd.f32 %v1216_v39, %v564_v25  ;;  %v631_v7 = vmax.f32 %v573_v48, 0.0 }
  0xea   : > { %v644_v3 = vadd.f32 %v643_v0, %v612_v63  ;;  %v613_v5 = vmax.f32 %v501_v1, 0.0  ;;  %v522_v16 = vadd.f32 %v932_v2, %v1216_v39  ;;  %v627_v0 = vmax.f32 %v557_v57, 0.0 }
  0xeb   : > { %v513_v6 = vpop.f32.mrf.mxu0  ;;  %v577_v43 = vpop.f32.mrf.mxu1 }
  0xec   : > { %v645_v9 = vadd.f32 %v644_v3, %v613_v5  ;;  %v514_v10 = vadd.f32 %v1216_v39, %v513_v6  ;;  %v618_v26 = vmax.f32 %v522_v16, 0.0  ;;  %v628_v3 = vmax.f32 %v562_v44, 0.0 }
  0xed   : > { %v933_v11 = vpop.f32.mrf.mxu0  ;;  %v949_v52 = vpop.f32.mrf.mxu1  ;;  %v629_v6 = vmax.f32 %v565_v53, 0.0  ;;  %v586_v16 = vadd.f32 %v948_v33, %v1216_v39 }
  0xee   : > { %v646_v13 = vadd.f32 %v645_v9, %v614_v8  ;;  %v616_v17 = vmax.f32 %v514_v10, 0.0  ;;  %v525_v22 = vadd.f32 %v933_v11, %v1216_v39  ;;  %v630_v9 = vmax.f32 %v570_v41, 0.0 }
  0xef   : > { %v516_v14 = vpop.f32.mrf.mxu0  ;;  %v580_v60 = vpop.f32.mrf.mxu1  ;;  %v578_v11 = vadd.f32 %v1216_v39, %v577_v43 }
  0xf0   : > { %v647_v18 = vadd.f32 %v646_v13, %v615_v12  ;;  %v517_v19 = vadd.f32 %v1216_v39, %v516_v14  ;;  %v619_v30 = vmax.f32 %v525_v22, 0.0  ;;  %v581_v13 = vadd.f32 %v1216_v39, %v580_v60 }
  0xf1   : > { %v936_v20 = vpop.f32.mrf.mxu0  ;;  %v952_v2 = vpop.f32.mrf.mxu1 }
  0xf2   : > { %v648_v21 = vadd.f32 %v647_v18, %v616_v17  ;;  %v617_v23 = vmax.f32 %v517_v19, 0.0  ;;  %v538_v34 = vadd.f32 %v936_v20, %v1216_v39  ;;  %v632_v17 = vmax.f32 %v578_v11, 0.0 }
  0xf3   : > { %v529_v24 = vpop.f32.mrf.mxu0  ;;  %v593_v8 = vpop.f32.mrf.mxu1  ;;  %v589_v19 = vadd.f32 %v949_v52, %v1216_v39  ;;  %v633_v20 = vmax.f32 %v581_v13, 0.0 }
  0xf4   : > { %v649_v27 = vadd.f32 %v648_v21, %v617_v23  ;;  %v530_v28 = vadd.f32 %v1216_v39, %v529_v24  ;;  %v622_v45 = vmax.f32 %v538_v34, 0.0  ;;  %v634_v21 = vmax.f32 %v586_v16, 0.0 }
  0xf5   : > { %v937_v29 = vpop.f32.mrf.mxu0  ;;  %v953_v14 = vpop.f32.mrf.mxu1  ;;  %v594_v23 = vadd.f32 %v1216_v39, %v593_v8  ;;  %v635_v24 = vmax.f32 %v589_v19, 0.0 }
  0xf6   : > { %v650_v31 = vadd.f32 %v649_v27, %v618_v26  ;;  %v620_v35 = vmax.f32 %v530_v28, 0.0  ;;  %v541_v40 = vadd.f32 %v937_v29, %v1216_v39  ;;  %v602_v27 = vadd.f32 %v952_v2, %v1216_v39 }
  0xf7   : > { %v532_v32 = vpop.f32.mrf.mxu0  ;;  %v596_v15 = vpop.f32.mrf.mxu1  ;;  %v636_v28 = vmax.f32 %v594_v23, 0.0 }
  0xf8   : > { %v651_v36 = vadd.f32 %v650_v31, %v619_v30  ;;  %v533_v37 = vadd.f32 %v1216_v39, %v532_v32  ;;  %v623_v49 = vmax.f32 %v541_v40, 0.0  ;;  %v597_v26 = vadd.f32 %v1216_v39, %v596_v15 }
  0xf9   : > { %v605_v31 = vadd.f32 %v953_v14, %v1216_v39  ;;  %v638_v33 = vmax.f32 %v602_v27, 0.0 }
  0xfa   : > { %v652_v38 = vadd.f32 %v651_v36, %v620_v35  ;;  %v621_v42 = vmax.f32 %v533_v37, 0.0  ;;  %v637_v32 = vmax.f32 %v597_v26, 0.0 }
  0xfb   : > { %v639_v35 = vmax.f32 %v605_v31, 0.0 }
  0xfc   : > { %v653_v47 = vadd.f32 %v652_v38, %v621_v42 }
  0xfe   : > { %v654_v50 = vadd.f32 %v653_v47, %v622_v45 }
 0x100   : > { %v655_v56 = vadd.f32 %v654_v50, %v623_v49  ;;  %v701_v49 = vld [vmem:[%s1282_s4] sm:$0x1] }
 0x102   : > { %v656_v59 = vadd.f32 %v655_v56, %v624_v55 }
 0x104   : > { %v657_v63 = vadd.f32 %v656_v59, %v625_v58 }
 0x106   : > { %v658_v1 = vadd.f32 %v657_v63, %v626_v62 }
 0x108   : > { %v659_v4 = vadd.f32 %v658_v1, %v627_v0 }
 0x10a   : > { %v660_v5 = vadd.f32 %v659_v4, %v628_v3 }
 0x10c   : > { %v661_v10 = vadd.f32 %v660_v5, %v629_v6 }
 0x10e   : > { %v662_v12 = vadd.f32 %v661_v10, %v630_v9 }
 0x110   : > { %v663_v61 = vadd.f32 %v662_v12, %v631_v7 }
 0x112   : > { %v664_v18 = vadd.f32 %v663_v61, %v632_v17 }
 0x114   : > { %v665_v22 = vadd.f32 %v664_v18, %v633_v20 }
 0x116   : > { %v666_v25 = vadd.f32 %v665_v22, %v634_v21 }
 0x118   : > { %v667_v29 = vadd.f32 %v666_v25, %v635_v24 }
 0x11a   : > { %v668_v30 = vadd.f32 %v667_v29, %v636_v28 }
 0x11c   : > { %v669_v34 = vadd.f32 %v668_v30, %v637_v32 }
 0x11e   : > { %v670_v36 = vadd.f32 %v669_v34, %v638_v33 }
 0x120   : > { %v671_v37 = vadd.f32 %v670_v36, %v639_v35 }
 0x122   : > { %v678_v38 = vrot.slane %v671_v37, 4 }
 0x124   : > { %v679_v40 = vadd.f32 %v678_v38, %v671_v37 }
 0x126   : > { %v680_v42 = vrot.slane %v679_v40, 2 }
 0x128   : > { %v681_v43 = vadd.f32 %v680_v42, %v679_v40 }
 0x12a   : > { %v682_v45 = vrot.slane %v681_v43, 1 }
 0x12c   : > { %v683_v46 = vadd.f32 %v682_v45, %v681_v43 }
 0x12e   : > { %v684_v47 = vmul.f32 0.00390625, %v683_v46 }
 0x130   : > { %987 = vmatmul.mubr.f32.vlgmr.msra.gmra.mxu1 %v684_v47 }
 0x1f0   : > { %v768_v39 = vpop.f32.mrf.mxu1 }
 0x1f1   : > { %v769_v50 = vadd.f32 %v768_v39, %v701_v49 }
 0x1f2   : > { %v988_v51 = vpop.f32.mrf.mxu1 }
 0x1f3   : > { %772 = vst [vmem:[%s248_s28] sm:$0x1] %v769_v50 }
 0x1f4 PF: > { %s15_s20 = sadd.s32 1, %s1064_s20   ;;  %s1284_s18 = smov %s1060_s19 }
 0x1f5   : > { %p12_p5 = scmp.ge.s32.totalorder %s15_s20, 4   ;;  %s1285_s19 = smov %s1287_s21 }
 0x1f7   :  { %14 = sbr.rel (!%p12_p5) target bundleno = 2 (0x2), region = 78 }

</bundles_post_ra>
